<compile_context>
chip_gen: v5e
topology: v5e:2x2
jax: 0.10.0
libtpu: 0.0.40
codegen_flags: <defaults>
</compile_context>

<pallas_src>
import math

import jax
import jax.numpy as jnp
from jax.experimental import pallas as pl
from jax.experimental.pallas import tpu as pltpu


def _round_up(n, m):
    return ((n + m - 1) // m) * m


def _pick_tb(rows, width, out_itemsize, block_b, granule):
    """Rows per grid step: multiple of `granule`, VMEM-safe, <= block_b."""
    if rows <= granule:
        return rows                                   # single small block
    budget = 16 << 20                                 # dbl-buffered block budget (v7x-safe)
    per_row = 2 * width * out_itemsize + 2 * 128 * 4  # out dbl-buf + lane-padded x tile
    cap = max(granule, budget // per_row)
    tb = min(block_b, cap, _round_up(rows, granule))
    return max(granule, (tb // granule) * granule)


def _emb_bcast_kernel(x_ref, tab_ref, out_ref):
    # x_ref:   (TB, 1)    f32  timesteps
    # tab_ref: (2, dim)   f32  row 0 = [freqs, freqs], row 1 = [0.., pi/2..]
    # out_ref: (TB, dim)       sin(x*f + phase)   (phase pi/2 -> cos)
    emb = x_ref[...] * tab_ref[0:1, :] + tab_ref[1:2, :]   # VPU broadcast mul/add
    out_ref[...] = jnp.sin(emb).astype(out_ref.dtype)      # EUP sin + one wide store


def _emb_dense_kernel(x_ref, tab_ref, out_ref):
    # Lane-dense path (dim < 128): G timesteps per output row.
    # x_ref:   (TB, G)        f32
    # tab_ref: (G+1, G*dim)   rows 0..G-1 = block-diag(freqs), row G = tiled phase
    # out_ref: (TB, G*dim)    full 128-lane store
    g = x_ref.shape[1]
    emb = jnp.dot(x_ref[...], tab_ref[0:g, :],
                  precision=jax.lax.Precision.HIGHEST,
                  preferred_element_type=jnp.float32) + tab_ref[g:g + 1, :]
    out_ref[...] = jnp.sin(emb).astype(out_ref.dtype)


def sinusoidal_pos_emb(x, dim, *, block_b=512, out_dtype=jnp.float32):
    """x: (B,) positions/timesteps. Returns (B, dim) sinusoidal embedding."""
    assert dim % 2 == 0, "dim must be even"
    assert dim >= 4, "dim must be >= 4 (dim==2 divides by zero, as in PyTorch)"
    half = dim // 2
    b = x.shape[0]

    # Constant tables (plain JAX glue, built once).
    scale = math.log(10000.0) / (half - 1)
    freqs = jnp.exp(jnp.arange(half, dtype=jnp.float32) * -scale)      # (half,)
    freqs_cat = jnp.concatenate([freqs, freqs]).reshape(1, dim)        # (1, dim)
    phase = jnp.concatenate(
        [jnp.zeros((half,), jnp.float32),
         jnp.full((half,), math.pi / 2.0, dtype=jnp.float32)]
    ).reshape(1, dim)                                                  # (1, dim)

    itemsize = jnp.dtype(out_dtype).itemsize
    granule = 16 if itemsize == 2 else 8
    xf = x.astype(jnp.float32)

    lane_dense = (dim < 128) and (128 % dim == 0) and (b % (128 // dim) == 0)
    if lane_dense:
        g = 128 // dim
        rows, width = b // g, g * dim                                  # width == 128
        x_in = xf.reshape(rows, g)
        tab = jnp.concatenate(
            [jnp.kron(jnp.eye(g, dtype=jnp.float32), freqs_cat),       # (g, 128)
             jnp.tile(phase, (1, g))], axis=0)                         # (g+1, 128)
        kernel, x_block_w = _emb_dense_kernel, g
    else:
        # TODO(synk): dims < 128 that don't divide 128 (or ragged B) still take
        # masked lane-partial stores here.
        rows, width = b, dim
        x_in = xf.reshape(rows, 1)
        tab = jnp.concatenate([freqs_cat, phase], axis=0)              # (2, dim)
        kernel, x_block_w = _emb_bcast_kernel, 1

    tb = _pick_tb(rows, width, itemsize, block_b, granule)
    grid = (pl.cdiv(rows, tb),)

    cost = pl.CostEstimate(
        flops=2 * b * dim,                 # one mul + one add per element
        transcendentals=b * dim,           # one sin per element
        bytes_accessed=b * 4 + tab.size * 4 + b * dim * itemsize,
    )

    out = pl.pallas_call(
        kernel,
        out_shape=jax.ShapeDtypeStruct((rows, width), out_dtype),
        grid=grid,
        in_specs=[
            pl.BlockSpec((tb, x_block_w), lambda i: (i, 0)),   # timestep tile
            pl.BlockSpec(tab.shape, lambda i: (0, 0)),         # constants (resident)
        ],
        out_specs=pl.BlockSpec((tb, width), lambda i: (i, 0)),
        compiler_params=pltpu.CompilerParams(
            dimension_semantics=("parallel",),
        ),
        cost_estimate=cost,
    )(x_in, tab)

    return out.reshape(b, dim)


def sinusoidal_pos_emb_ref(x, dim):
    """Pure-JAX reference mirroring the PyTorch forward exactly."""
    half_dim = dim // 2
    emb = math.log(10000.0) / (half_dim - 1)
    emb = jnp.exp(jnp.arange(half_dim, dtype=jnp.float32) * -emb)
    emb = x.astype(jnp.float32)[:, None] * emb[None, :]
    return jnp.concatenate([jnp.sin(emb), jnp.cos(emb)], axis=-1)


if __name__ == "__main__":
    key = jax.random.PRNGKey(0)

    # Case 1: small diffusion-style batch, dim < 128 -> lane-dense path.
    B, DIM = 8, 32
    x = jax.random.uniform(key, (B,), dtype=jnp.float32, minval=0.0, maxval=1000.0)
    out = jax.block_until_ready(sinusoidal_pos_emb(x, DIM))
    ref = sinusoidal_pos_emb_ref(x, DIM)
    assert out.shape == (B, DIM)
    assert jnp.allclose(out, ref, atol=5e-4), "mismatch vs reference (B=8, dim=32)"

    # Case 2: ragged batch, lane-full dim -> broadcast path with clipped last block.
    B2, DIM2 = 50, 128
    x2 = jax.random.uniform(jax.random.PRNGKey(1), (B2,), dtype=jnp.float32,
                            minval=0.0, maxval=1000.0)
    out2 = jax.block_until_ready(sinusoidal_pos_emb(x2, DIM2))
    ref2 = sinusoidal_pos_emb_ref(x2, DIM2)
    assert out2.shape == (B2, DIM2)
    assert jnp.allclose(out2, ref2, atol=5e-4), "mismatch vs reference (B=50, dim=128)"

    # Case 3: multi-step grid with ragged tail (small block_b to force grid=4).
    B3, DIM3 = 200, 128
    x3 = jax.random.uniform(jax.random.PRNGKey(2), (B3,), dtype=jnp.float32,
                            minval=0.0, maxval=1000.0)
    out3 = jax.block_until_ready(sinusoidal_pos_emb(x3, DIM3, block_b=64))
    ref3 = sinusoidal_pos_emb_ref(x3, DIM3)
    assert out3.shape == (B3, DIM3)
    assert jnp.allclose(out3, ref3, atol=5e-4), "mismatch vs reference (B=200, dim=128)"

    # Case 4: bf16 output path (f32 math, cast at the store, 16-row granule).
    out4 = jax.block_until_ready(
        sinusoidal_pos_emb(x2, DIM2, out_dtype=jnp.bfloat16))
    assert out4.dtype == jnp.bfloat16
    assert jnp.allclose(out4.astype(jnp.float32), ref2, atol=8e-3), \
        "mismatch vs reference (bf16 output)"

    print("KERNEL_OK")
</pallas_src>

<mosaic_0001>
module attributes {stable_mosaic.version = 11 : i64} {
  func.func @_emb_dense_kernel(%arg0: i32, %arg1: memref<2x4xf32, #tpu.memory_space<vmem>>, %arg2: memref<5x128xf32, #tpu.memory_space<vmem>>, %arg3: memref<2x128xf32, #tpu.memory_space<vmem>>) attributes {dimension_semantics = [#tpu.dimension_semantics<parallel>], iteration_bounds = array<i64: 1>, scalar_prefetch = 0 : i64, scratch_operands = 0 : i64, tpu.core_type = #tpu.core_type<tc>, window_params = [{transform_indices = @transform_0, window_bounds = array<i64: 2, 4>}, {pipeline_mode = #tpu.pipeline_mode<synchronous>, transform_indices = @transform_1, window_bounds = array<i64: 5, 128>}, {transform_indices = @transform_2, window_bounds = array<i64: 2, 128>}]} {
    %c0 = arith.constant 0 : index
    %c0_0 = arith.constant 0 : index
    %0 = vector.load %arg1[%c0, %c0_0] : memref<2x4xf32, #tpu.memory_space<vmem>>, vector<2x4xf32>
    %c0_1 = arith.constant 0 : index
    %c0_2 = arith.constant 0 : index
    %1 = vector.load %arg2[%c0_1, %c0_2] : memref<5x128xf32, #tpu.memory_space<vmem>>, vector<4x128xf32>
    %cst = arith.constant dense<0.000000e+00> : vector<2x128xf32>
    %2 = tpu.matmul %0, %1, %cst {dimension_numbers = #tpu.dot_dimension_numbers<[1], [0], [0], [1], [0, 0, 1, 1], [], []>, precision = #tpu.contract_precision<fp32>} : vector<2x4xf32>, vector<4x128xf32>, vector<2x128xf32> -> vector<2x128xf32>
    %c4 = arith.constant 4 : index
    %c0_3 = arith.constant 0 : index
    %3 = vector.load %arg2[%c4, %c0_3] : memref<5x128xf32, #tpu.memory_space<vmem>>, vector<1x128xf32>
    %4 = vector.broadcast %3 : vector<1x128xf32> to vector<2x128xf32>
    %5 = arith.addf %2, %4 : vector<2x128xf32>
    %6 = math.sin %5 : vector<2x128xf32>
    %c0_4 = arith.constant 0 : index
    %c0_5 = arith.constant 0 : index
    %7 = vector.load %arg3[%c0_4, %c0_5] : memref<2x128xf32, #tpu.memory_space<vmem>>, vector<2x128xf32>
    tpu.vector_store %arg3[%c0_4, %c0_5], %6 {strides = array<i32>} : memref<2x128xf32, #tpu.memory_space<vmem>>, vector<2x128xf32>,
    return
  }
  func.func @transform_0(%arg0: i32) -> (i32, i32) {
    %c0_i32 = arith.constant 0 : i32
    %c0_i32_0 = arith.constant 0 : i32
    return %arg0, %c0_i32 : i32, i32
  }
  func.func @transform_1(%arg0: i32) -> (i32, i32) {
    %c0_i32 = arith.constant 0 : i32
    %c0_i32_0 = arith.constant 0 : i32
    %c0_i32_1 = arith.constant 0 : i32
    return %c0_i32, %c0_i32_0 : i32, i32
  }
  func.func @transform_2(%arg0: i32) -> (i32, i32) {
    %c0_i32 = arith.constant 0 : i32
    %c0_i32_0 = arith.constant 0 : i32
    return %arg0, %c0_i32 : i32, i32
  }
}

</mosaic_0001>

<bundles_post_ra>
// kernel: tpu_custom_call.1
= control target key start
LH: loop header
LB: loop body
LE: loop exit
PB: predicated region body
PF: predicated region fallthrough
CT: control target
= control target key end

     0   :  { %7 = vsyncpa [#allocation3], 0  ;;  %s554_s0 = inlined_call_operand.hbm [shape: f32[2,4], index: 0, kind: input, shape index: {}]   ;;  %s555_s1 = inlined_call_operand.hbm [shape: f32[5,128], index: 1, kind: input, shape index: {}]   ;;  %s556_s2 = inlined_call_operand.hbm [shape: f32[2,128], index: 2, kind: output, shape index: {}]  }
   0x1   :  { %8 = vsyncpa [#allocation6], 0 }
   0x2   :  { %9 = vsyncpa [#allocation4], 0  ;;  %s15_s11 = sshll.u32 %s554_s0, 4  ;;  %s464_s12 = smov [#allocation2]   ;;  %s16_s11 = int_to_ptr.hbm [resolvable:$true] %s15_s11 }
   0x3   :  { %s17_s13 = sshll.u32 %s464_s12, 4  ;;  %s26_s16 = sshll.u32 %s555_s1, 4  ;;  %s18_s13 = int_to_ptr.vmem [resolvable:$true] %s17_s13  ;;  %s27_s16 = int_to_ptr.hbm [resolvable:$true] %s26_s16 }
   0x4   :  { %20 = dma.hbm_to_vmem [thread:$0]  %s16_s11, 32, %s18_s13, [#allocation3]  }
   0x5   :  { %s465_s17 = smov [#allocation5]  }
   0x6   :  { %s28_s18 = sshll.u32 %s465_s17, 4  ;;  %s29_s18 = int_to_ptr.vmem [resolvable:$true] %s28_s18 }
   0x7   :  { %31 = dma.hbm_to_vmem [thread:$0]  %s27_s16, 128, %s29_s18, [#allocation6]  }
   0x8   :  { %458 = dma.done.wait [#allocation3], 32  }
   0x9   :  { %459 = vsyncadd [#allocation3], 4294967264 }
   0xa   :  { %460 = dma.done.wait [#allocation6], 128  }
   0xb   :  { %461 = vsyncadd [#allocation6], 4294967168  ;;  %vm48_vm0 = vcmask 1043456   ;;  %vm44_vm1 = vcmask 31744   ;;  %v41_v0 = vld [vmem:[#allocation5] sm:$0xf] }
   0xc   :  { %v40_v1 = vld [vmem:[#allocation2] sm:$0x3]  ;;  %v50_v2 = vsel %vm48_vm0, %v41_v0, 0  ;;  %v385_v14 = vld [vmem:[#allocation5 + $0x4] ss:$0 sm:$0xff]  ;;  %s473_s0 = smov [#allocation7]  }
   0xd   :  { %v46_v3 = vsel %vm44_vm1, %v40_v1, 0  ;;  %v67_v4 = vand.u32 4294901760, %v50_v2  ;;  %v466_v38 = vmov 683565275   ;;  %v467_v40 = vmov 2475754826  }
   0xe   :  { %v69_v5 = vand.u32 4294901760, %v46_v3  ;;  %v468_v43 = vmov 2131351028   ;;  %v469_v46 = vmov 2102212464   ;;  %s359_s1 = sshll.u32 %s473_s0, 4  ;;  %s360_s1 = int_to_ptr.vmem [resolvable:$true] %s359_s1 }
   0xf   :  { %v94_v6 = vsub.f32 %v50_v2, %v67_v4  ;;  %68 = vmatpush.msra.mxu0 %v67_v4  ;;  %144 = vmatpush.msra.mxu3 %v67_v4  ;;  %v470_v49 = vmov 920167782   ;;  %v471_v52 = vmov 1326507024   ;;  %s361_s21 = sshll.u32 %s556_s2, 4  ;;  %s362_s21 = int_to_ptr.hbm [resolvable:$true] %s361_s21 }
  0x10   :  { %v70_v7 = vsub.f32 %v46_v3, %v69_v5 }
  0x11   :  { %121 = vmatpush.msra.mxu2 %v94_v6  ;;  %v95_v9 = vand.u32 4294901760, %v94_v6 }
  0x12   :  { %v71_v8 = vand.u32 4294901760, %v70_v7  ;;  %124 = vmatmul.f32.vlgmr.msra.gmra.mxu2 %v70_v7 }
  0x13   :  { %170 = vmatpush.msrb.mxu0 %v95_v9  ;;  %v96_v11 = vsub.f32 %v94_v6, %v95_v9 }
  0x14   :  { %v72_v10 = vsub.f32 %v70_v7, %v71_v8  ;;  %148 = vmatmul.f32.vlgmr.msra.gmra.mxu3 %v71_v8 }
  0x15   :  { %v97_v13 = vand.u32 4294901760, %v96_v11 }
  0x16   :  { %v73_v12 = vand.u32 4294901760, %v72_v10 }
  0x17   :  { %98 = vmatpush.msra.mxu1 %v97_v13 }
  0x18   :  { %74 = vmatmul.f32.vlgmr.msra.gmra.mxu0 %v73_v12  ;;  %100 = vmatmul.f32.vlgmr.msra.gmra.mxu1 %v69_v5 }
  0x19   :  { %192 = vmatpush.msrb.mxu1 %v67_v4 }
  0x20   :  { %172 = vmatmul.f32.vlgmr.msrb.gmra.mxu0 %v69_v5  ;;  %194 = vmatmul.f32.vlgmr.msrb.gmra.mxu1 %v69_v5 }
  0x95   :  { %v75_v15 = vpop.f32.mrf.mxu0  ;;  %v101_v17 = vpop.f32.mrf.mxu1 }
  0x96   :  { %v76_v16 = vadd.f32 %v385_v14, %v75_v15  ;;  %v125_v18 = vpop.f32.mrf.mxu2 }
  0x97   :  { %v149_v20 = vpop.f32.mrf.mxu3 }
  0x98   :  { %v102_v19 = vadd.f32 %v101_v17, %v76_v16 }
  0x9a   :  { %v126_v21 = vadd.f32 %v125_v18, %v102_v19 }
  0x9c   :  { %v150_v22 = vadd.f32 %v149_v20, %v126_v21 }
  0x9d   :  { %v173_v23 = vpop.f32.mrf.mxu0  ;;  %v195_v25 = vpop.f32.mrf.mxu1 }
  0x9e   :  { %v174_v24 = vadd.f32 %v173_v23, %v150_v22  ;;  %v472_v22 = vmov 0  }
  0xa0   :  { %v495_v26 = vadd.f32 %v195_v25, %v174_v24 }
  0xa2   :  { %v201_v27 = vand.u32 2139095040, %v495_v26  ;;  %v198_v30 = vand.u32 2147483647, %v495_v26  ;;  %vm200_vm14 = vcmp.lt.s32.totalorder %v495_v26, 0 }
  0xa4   :  { %v202_v28 = vshrl.u32 %v201_v27, 23  ;;  %v205_v32 = vand.u32 8388607, %v198_v30  ;;  %vm199_vm15 = vcmp.le.f32.partialorder %v198_v30, 0.7853982 }
  0xa6   :  { %v372_v29 = vadd.s32 4294967169, %v202_v28  ;;  %v206_v36 = vor.u32 8388608, %v205_v32 }
  0xa8   :  { %v208_v31 = vadd.s32 1, %v372_v29  ;;  %v512_v59 = vshll.u32 %v206_v36, 8 }
  0xaa   :  { %vm209_vm2 = vcmp.gt.s32.totalorder %v208_v31, 0  ;;  %v247_v4 = vand.u32 65535, %v512_v59  ;;  %v248_v5 = vshrl.u32 %v512_v59, 16 }
  0xab   :  { %v210_v33 = vsel %vm209_vm2, %v208_v31, 0 }
  0xac   :  { %v212_v34 = vand.u32 31, %v210_v33  ;;  %v503_v37 = vshrl.u32 %v210_v33, 5 }
  0xae   :  { %v501_v35 = vsub.s32 32, %v212_v34  ;;  %v215_v39 = vshll.u32 %v466_v38, %v212_v34  ;;  %v218_v41 = vshll.u32 %v467_v40, %v212_v34  ;;  %v221_v45 = vshll.u32 %v468_v43, %v212_v34 }
  0xaf   :  { %v224_v48 = vshll.u32 %v469_v46, %v212_v34  ;;  %v227_v51 = vshll.u32 %v470_v49, %v212_v34  ;;  %vm230_vm3 = vcmp.lt.s32.totalorder %v503_v37, 1  ;;  %vm233_vm4 = vcmp.lt.s32.totalorder %v503_v37, 4 }
  0xb0   :  { %v216_v42 = vshrl.u32 %v467_v40, %v501_v35  ;;  %v219_v44 = vshrl.u32 %v468_v43, %v501_v35  ;;  %v222_v47 = vshrl.u32 %v469_v46, %v501_v35  ;;  %v225_v50 = vshrl.u32 %v470_v49, %v501_v35 }
  0xb1   :  { %v228_v53 = vshrl.u32 %v471_v52, %v501_v35  ;;  %vm232_vm5 = vcmp.lt.s32.totalorder %v503_v37, 3  ;;  %vm231_vm6 = vcmp.lt.s32.totalorder %v503_v37, 2  ;;  %v214_v33 = vshrl.u32 %v466_v38, %v501_v35 }
  0xb2   :  { %v217_v54 = vor.u32 %v216_v42, %v215_v39  ;;  %v220_v55 = vor.u32 %v219_v44, %v218_v41  ;;  %v223_v56 = vor.u32 %v222_v47, %v221_v45  ;;  %v226_v57 = vor.u32 %v225_v50, %v224_v48 }
  0xb3   :  { %v229_v58 = vor.u32 %v228_v53, %v227_v51 }
  0xb4   :  { %v238_v60 = vsel %vm230_vm3, %v217_v54, %v220_v55  ;;  %v242_v61 = vsel %vm230_vm3, %v220_v55, %v223_v56  ;;  %v239_v62 = vsel %vm233_vm4, %v226_v57, 920167782  ;;  %v235_v29 = vsel %vm233_vm4, %v223_v56, 2102212464 }
  0xb5   :  { %v243_v63 = vsel %vm233_vm4, %v229_v58, 1326507024  ;;  %v240_v0 = vsel %vm232_vm5, %v223_v56, %v239_v62  ;;  %v234_v42 = vsel %vm230_vm3, %v214_v33, %v217_v54  ;;  %v236_v43 = vsel %vm232_vm5, %v220_v55, %v235_v29 }
  0xb6   :  { %v244_v1 = vsel %vm232_vm5, %v226_v57, %v243_v63  ;;  %v241_v2 = vsel %vm231_vm6, %v238_v60, %v240_v0  ;;  %v237_v35 = vsel %vm231_vm6, %v234_v42, %v236_v43  ;;  %vm341_vm3 = vweird.f32 %v495_v26 }
  0xb7   :  { %v245_v3 = vsel %vm231_vm6, %v242_v61, %v244_v1  ;;  %v271_v8 = vand.u32 65535, %v241_v2  ;;  %v272_v9 = vshrl.u32 %v241_v2, 16  ;;  %v291_v51 = vmul.u32 %v512_v59, %v237_v35 }
  0xb8   :  { %v249_v6 = vand.u32 65535, %v245_v3  ;;  %v250_v7 = vshrl.u32 %v245_v3, 16 }
  0xb9   :  { %v274_v12 = vmul.u32 %v272_v9, %v247_v4  ;;  %v275_v13 = vmul.u32 %v271_v8, %v248_v5  ;;  %v273_v17 = vmul.u32 %v271_v8, %v247_v4  ;;  %v276_v21 = vmul.u32 %v272_v9, %v248_v5 }
  0xba   :  { %v252_v10 = vmul.u32 %v250_v7, %v247_v4  ;;  %v253_v11 = vmul.u32 %v249_v6, %v248_v5  ;;  %v251_v14 = vmul.u32 %v249_v6, %v247_v4  ;;  %v254_v16 = vmul.u32 %v250_v7, %v248_v5 }
  0xbb   :  { %v277_v18 = vshll.u32 %v274_v12, 16  ;;  %v279_v24 = vshll.u32 %v275_v13, 16  ;;  %v278_v40 = vshrl.u32 %v274_v12, 16  ;;  %v280_v46 = vshrl.u32 %v275_v13, 16 }
  0xbc   :  { %v255_v15 = vshll.u32 %v252_v10, 16  ;;  %v257_v19 = vshll.u32 %v253_v11, 16  ;;  %v256_v34 = vshrl.u32 %v252_v10, 16  ;;  %v258_v44 = vshrl.u32 %v253_v11, 16 }
  0xbd   :  { %vm281_vm8 = vc.u32 %v273_v17, %v277_v18  ;;  %v283_v25 = vadd.s32 %v277_v18, %v273_v17 }
  0xbe   :  { %vm259_vm7 = vc.u32 %v251_v14, %v255_v15  ;;  %v261_v20 = vadd.s32 %v255_v15, %v251_v14  ;;  %v282_v28 = vsel %vm281_vm8, 1, %v472_v22 }
  0xbf   :  { %v260_v23 = vsel %vm259_vm7, 1, %v472_v22  ;;  %v284_v32 = vadd.s32 %v282_v28, %v276_v21  ;;  %vm285_vm10 = vc.u32 %v283_v25, %v279_v24  ;;  %v287_v49 = vadd.s32 %v283_v25, %v279_v24 }
  0xc0   :  { %v262_v27 = vadd.s32 %v260_v23, %v254_v16  ;;  %vm263_vm9 = vc.u32 %v261_v20, %v257_v19  ;;  %v286_v39 = vsel %vm285_vm10, 1, %v472_v22 }
  0xc1   :  { %v264_v31 = vsel %vm263_vm9, 1, %v472_v22  ;;  %v288_v41 = vadd.s32 %v286_v39, %v284_v32 }
  0xc2   :  { %v266_v36 = vadd.s32 %v264_v31, %v262_v27 }
  0xc3   :  { %v289_v47 = vadd.s32 %v288_v41, %v278_v40 }
  0xc4   :  { %v267_v45 = vadd.s32 %v266_v36, %v256_v34 }
  0xc5   :  { %v290_v38 = vadd.s32 %v289_v47, %v280_v46 }
  0xc6   :  { %v268_v48 = vadd.s32 %v267_v45, %v258_v44 }
  0xc7   :  { %v294_v50 = vadd.s32 1, %v290_v38 }
  0xc8   :  { %vm293_vm11 = vc.u32 %v268_v48, %v287_v49  ;;  %v292_v37 = vadd.s32 %v287_v49, %v268_v48 }
  0xc9   :  { %v295_v52 = vsel %vm293_vm11, %v294_v50, %v290_v38 }
  0xca   :  { %v296_v53 = vadd.s32 %v295_v52, %v291_v51 }
  0xcc   :  { %v297_v54 = vadd.s32 536870912, %v296_v53 }
  0xce   :  { %v298_v56 = vshrl.u32 %v297_v54, 30 }
  0xd0   :  { %v299_v57 = vshll.u32 %v298_v56, 30  ;;  %v322_v13 = vsub.s32 4, %v298_v56 }
  0xd2   :  { %v300_v55 = vsub.s32 %v296_v53, %v299_v57  ;;  %v323_v17 = vsel %vm200_vm14, %v322_v13, %v298_v56 }
  0xd3   :  { %v325_v20 = vsel %vm199_vm15, 0, %v323_v17 }
  0xd4   :  { %vm301_vm12 = vcmp.lt.s32.totalorder %v300_v55, 0  ;;  %v302_v58 = vsub.s32 0, %v300_v55  ;;  %v342_v25 = vadd.s32 3, %v325_v20 }
  0xd6   :  { %v303_v60 = vsel %vm301_vm12, %v302_v58, %v300_v55  ;;  %v343_v31 = vand.u32 3, %v342_v25 }
  0xd7   :  { %v304_v61 = vclz %v303_v60 }
  0xd8   :  { %vm345_vm0 = vcmp.eq.s32.totalorder %v343_v31, 0  ;;  %vm348_vm1 = vcmp.eq.s32.totalorder %v343_v31, 2  ;;  %vm344_vm2 = vcmp.lt.s32.totalorder %v343_v31, 2 }
  0xd9   :  { %v373_v62 = vadd.s32 4294967294, %v304_v61 }
  0xdb   :  { %vm374_vm13 = vcmp.lt.s32.totalorder %v373_v62, 0 }
  0xdc   :  { %v307_v63 = vsel %vm374_vm13, 0, %v373_v62 }
  0xdd   :  { %v308_v0 = vsub.s32 32, %v307_v63  ;;  %v312_v1 = vsub.s32 4294967266, %v307_v63  ;;  %v309_v2 = vshll.u32 %v300_v55, %v307_v63 }
  0xdf   :  { %v310_v3 = vshrl.u32 %v292_v37, %v308_v0  ;;  %v313_v4 = vadd.s32 127, %v312_v1 }
  0xe1   :  { %v311_v59 = vor.u32 %v310_v3, %v309_v2  ;;  %v314_v5 = vshll.u32 %v313_v4, 23 }
  0xe3   :  { %v315_v6 = vor.u32 4788187, %v314_v5  ;;  %v318_v8 = vcvt.s32.f32 %v311_v59 }
  0xe5   :  { %v316_v7 = vand.u32 2147483647, %v315_v6 }
  0xe7   :  { %v319_v9 = vmul.f32 %v318_v8, %v316_v7 }
  0xe9   :  { %v320_v10 = vxor.u32 2147483648, %v319_v9 }
  0xeb   :  { %v321_v11 = vsel %vm200_vm14, %v320_v10, %v319_v9 }
  0xec   :  { %v324_v12 = vsel %vm199_vm15, %v495_v26, %v321_v11 }
  0xed   :  { %v326_v14 = vmul.f32 %v324_v12, %v324_v12 }
  0xef   :  { %v327_v15 = vmul.f32 -0.001358992, %v326_v14  ;;  %v334_v16 = vmul.f32 -0.00019511016, %v326_v14 }
  0xf1   :  { %v328_v18 = vadd.f32 0.041655596, %v327_v15  ;;  %v335_v19 = vadd.f32 0.008332121, %v334_v16 }
  0xf3   :  { %v329_v21 = vmul.f32 %v328_v18, %v326_v14  ;;  %v336_v22 = vmul.f32 %v335_v19, %v326_v14 }
  0xf5   :  { %v330_v23 = vadd.f32 -0.4999988, %v329_v21  ;;  %v337_v24 = vadd.f32 -0.16666654, %v336_v22 }
  0xf7   :  { %v331_v27 = vmul.f32 %v330_v23, %v326_v14  ;;  %v338_v28 = vmul.f32 %v337_v24, %v326_v14 }
  0xf9   :  { %v332_v29 = vadd.f32 1.0, %v331_v27  ;;  %v339_v30 = vadd.f32 1.0, %v338_v28 }
  0xfb   :  { %v340_v32 = vmul.f32 %v339_v30, %v324_v12  ;;  %v349_v33 = vxor.u32 2147483648, %v332_v29 }
  0xfd   :  { %v346_v34 = vxor.u32 2147483648, %v340_v32  ;;  %v350_v39 = vsel %vm348_vm1, %v349_v33, %v340_v32 }
  0xff   :  { %v347_v36 = vsel %vm345_vm0, %v332_v29, %v346_v34 }
 0x100   :  { %v351_v40 = vsel %vm344_vm2, %v347_v36, %v350_v39 }
 0x101   :  { %v352_v41 = vsel %vm341_vm3, nan, %v351_v40 }
 0x102   :  { %353 = vst [vmem:[#allocation7] sm:$0x3] %v352_v41 }
 0x103   :  { %364 = dma.vmem_to_hbm [thread:$0]  %s360_s1, 32, %s362_s21, [#allocation4]  }
 0x104   :  { %462 = dma.done.wait [#allocation4], 32  }
 0x105   :  { %463 = vsyncadd [#allocation4], 4294967264 }
 0x106   :  { %369 = vsyncpa [#allocation3], 1 }
 0x107   :  { %370 = vsyncpa [#allocation6], 1 }
 0x108   :  { %371 = vsyncpa [#allocation4], 1 }

</bundles_post_ra>
